<compile_context>
chip_gen: v7x
topology: tpu7x:2x2x1
jax: 0.10.0
libtpu: 0.0.40
codegen_flags: <defaults>
</compile_context>

<pallas_src>
from functools import partial

import numpy as np
import jax
import jax.numpy as jnp
from jax.experimental import pallas as pl
from jax.experimental.pallas import tpu as pltpu


def _dwconv_kernel(x_ref, pvec_ref, pw_ref, o_ref, *, H, W, C, O, G, L, eps):
    HW = H * W
    cg = C // G

    x = x_ref[0]                    # (C, P) halo-padded flat sample
    pv = pvec_ref[...]              # (C, 12): [0:9] dw taps, 9 bias, 10 gamma, 11 beta

    # Column-validity masks for the horizontal taps (vertical halo is zero-padded).
    w_idx = jax.lax.broadcasted_iota(jnp.int32, (C, HW), 1) % W
    m_left = w_idx >= 1             # valid when reading column w-1
    m_right = w_idx <= (W - 2)      # valid when reading column w+1

    bias = pv[:, 9:10]              # (C, 1)

    # Depthwise 3x3 conv: 9 static lane-offset slices of the flat padded row buffer.
    acc = None
    t = 0
    for dh in (-1, 0, 1):
        for dw in (-1, 0, 1):
            start = L + dh * W + dw
            xs = x[:, start:start + HW]                   # (C, HW)
            if dw == -1:
                xs = jnp.where(m_left, xs, 0.0)
            elif dw == 1:
                xs = jnp.where(m_right, xs, 0.0)
            contrib = xs * pv[:, t:t + 1]                 # per-channel tap weight
            acc = (contrib + bias) if acc is None else (acc + contrib)
            t += 1

    # GroupNorm(G): reduce over (cg * H * W) elements per group.  For this module the
    # test config has cg == 1, so the reshape below is a no-op.
    # TODO(synk): for cg > 1 the (C,HW)->(G,cg*HW) reshape is a sublane->lane relayout;
    # re-validate Mosaic lowering before scaling the channel count.
    accg = acc.reshape(G, cg * HW)
    inv_n = 1.0 / float(cg * HW)
    mean = jnp.sum(accg, axis=1, keepdims=True) * inv_n
    meansq = jnp.sum(accg * accg, axis=1, keepdims=True) * inv_n
    var = jnp.maximum(meansq - mean * mean, 0.0)          # clamp f32 cancellation
    inv = jax.lax.rsqrt(var + eps)
    xn = ((accg - mean) * inv).reshape(C, HW)
    xn = xn * pv[:, 10:11] + pv[:, 11:12]                 # per-channel affine

    # 1x1 conv across channels: single MXU matmul, lane-dense (O, HW) store.
    wpw = pw_ref[:, :C]                                   # (O, C)
    bpw = pw_ref[:, C:C + 1]                              # (O, 1)
    out = jnp.dot(wpw, xn, preferred_element_type=jnp.float32) + bpw
    o_ref[0] = out.astype(o_ref.dtype)


def depthwise_conv2d(x, params, *, kernel_size=3, padding=1, gn_groups=4, eps=1e-5):
    wdw, bdw, gamma, beta, wpw, bpw = params
    N, C, H, W = x.shape
    O = wpw.shape[0]
    assert kernel_size == 3 and padding == 1, "kernel specialized for 3x3, pad=1"
    assert C % gn_groups == 0
    HW = H * W

    # Flat-spatial halo padding: >= W+1 zeros on each side covers the +-1 row shifts;
    # round the padded row length up to a multiple of 128 lanes.
    L = W + 1
    P = ((L + HW + W + 1 + 127) // 128) * 128
    R = P - L - HW
    x_flat = jnp.pad(x.reshape(N, C, HW), ((0, 0), (0, 0), (L, R)))

    # Fused parameter tables (cuts per-step input DMAs from 7 tiny transfers to 2).
    pvec = jnp.concatenate(
        [wdw.reshape(C, kernel_size * kernel_size),
         bdw[:, None], gamma[:, None], beta[:, None]], axis=1)      # (C, 12)
    pw = jnp.concatenate([wpw, bpw[:, None]], axis=1)               # (O, C+1)

    kernel = partial(_dwconv_kernel, H=H, W=W, C=C, O=O, G=gn_groups, L=L, eps=eps)

    out_flat = pl.pallas_call(
        kernel,
        out_shape=jax.ShapeDtypeStruct((N, O, HW), x.dtype),
        grid=(N,),
        in_specs=[
            pl.BlockSpec((1, C, P), lambda n: (n, 0, 0)),
            pl.BlockSpec((C, pvec.shape[1]), lambda n: (0, 0)),
            pl.BlockSpec((O, C + 1), lambda n: (0, 0)),
        ],
        out_specs=pl.BlockSpec((1, O, HW), lambda n: (n, 0, 0)),
        compiler_params=pltpu.CompilerParams(dimension_semantics=("parallel",)),
    )(x_flat, pvec, pw)
    return out_flat.reshape(N, O, H, W)


def reference(x, params, *, gn_groups=4, eps=1e-5):
    """Pure-JAX reference matching the PyTorch module semantics."""
    wdw, bdw, gamma, beta, wpw, bpw = params
    N, C, H, W = x.shape
    O = wpw.shape[0]
    y = jax.lax.conv_general_dilated(
        x, wdw.reshape(C, 1, 3, 3), window_strides=(1, 1),
        padding=((1, 1), (1, 1)), feature_group_count=C,
        dimension_numbers=("NCHW", "OIHW", "NCHW"),
        precision=jax.lax.Precision.HIGHEST)
    y = y + bdw.reshape(1, C, 1, 1)
    cg = C // gn_groups
    yg = y.reshape(N, gn_groups, cg, H, W)
    mean = yg.mean(axis=(2, 3, 4), keepdims=True)
    var = yg.var(axis=(2, 3, 4), keepdims=True)
    yn = ((yg - mean) / jnp.sqrt(var + eps)).reshape(N, C, H, W)
    yn = yn * gamma.reshape(1, C, 1, 1) + beta.reshape(1, C, 1, 1)
    out = jnp.einsum("oc,nchw->nohw", wpw, yn,
                     precision=jax.lax.Precision.HIGHEST)
    return out + bpw.reshape(1, O, 1, 1)


if __name__ == "__main__":
    N, C, O, H, W = 2, 4, 8, 16, 16   # dim_in=4 (GroupNorm needs C % 4 == 0), dim_out=8

    key = jax.random.PRNGKey(0)
    ks = jax.random.split(key, 7)
    x = jax.random.normal(ks[0], (N, C, H, W), jnp.float32)
    wdw = jax.random.normal(ks[1], (C, 3, 3), jnp.float32) * 0.2     # conv1 weight (depthwise)
    bdw = jax.random.normal(ks[2], (C,), jnp.float32) * 0.1          # conv1 bias
    gamma = 1.0 + 0.1 * jax.random.normal(ks[3], (C,), jnp.float32)  # GroupNorm weight
    beta = 0.1 * jax.random.normal(ks[4], (C,), jnp.float32)         # GroupNorm bias
    wpw = jax.random.normal(ks[5], (O, C), jnp.float32) * 0.3        # conv2 weight (1x1)
    bpw = jax.random.normal(ks[6], (O,), jnp.float32) * 0.1          # conv2 bias
    params = (wdw, bdw, gamma, beta, wpw, bpw)

    out = jax.block_until_ready(depthwise_conv2d(x, params))
    ref = jax.block_until_ready(reference(x, params))
    np.testing.assert_allclose(np.asarray(out), np.asarray(ref), rtol=5e-3, atol=5e-3)

    print("KERNEL_OK")
</pallas_src>

<mosaic_0001>
module attributes {stable_mosaic.version = 11 : i64} {
  func.func @_dwconv_kernel(%arg0: i32, %arg1: memref<1x4x384xf32, #tpu.memory_space<vmem>>, %arg2: memref<4x12xf32, #tpu.memory_space<vmem>>, %arg3: memref<8x5xf32, #tpu.memory_space<vmem>>, %arg4: memref<1x8x256xf32, #tpu.memory_space<vmem>>) attributes {dimension_semantics = [#tpu.dimension_semantics<parallel>], iteration_bounds = array<i64: 2>, scalar_prefetch = 0 : i64, scratch_operands = 0 : i64, tpu.core_type = #tpu.core_type<tc>, window_params = [{transform_indices = @transform_0, window_bounds = array<i64: 1, 4, 384>}, {pipeline_mode = #tpu.pipeline_mode<synchronous>, transform_indices = @transform_1, window_bounds = array<i64: 4, 12>}, {pipeline_mode = #tpu.pipeline_mode<synchronous>, transform_indices = @transform_2, window_bounds = array<i64: 8, 5>}, {transform_indices = @transform_3, window_bounds = array<i64: 1, 8, 256>}]} {
    %c0 = arith.constant 0 : index
    %c0_0 = arith.constant 0 : index
    %c0_1 = arith.constant 0 : index
    %0 = vector.load %arg1[%c0, %c0_0, %c0_1] : memref<1x4x384xf32, #tpu.memory_space<vmem>>, vector<1x4x384xf32>
    %1 = vector.shape_cast %0 : vector<1x4x384xf32> to vector<4x384xf32>
    %c0_2 = arith.constant 0 : index
    %c0_3 = arith.constant 0 : index
    %2 = vector.load %arg2[%c0_2, %c0_3] : memref<4x12xf32, #tpu.memory_space<vmem>>, vector<4x12xf32>
    %3 = tpu.iota {dimensions = array<i32: 1>} : vector<4x256xi32>
    %c16_i32 = arith.constant 16 : i32
    %c0_i32 = arith.constant 0 : i32
    %4 = arith.cmpi eq, %c16_i32, %c0_i32 : i32
    %c1_i32 = arith.constant 1 : i32
    %5 = arith.select %4, %c1_i32, %c16_i32 : i32
    %6 = vector.broadcast %5 : i32 to vector<4x256xi32>
    %7 = arith.remsi %3, %6 : vector<4x256xi32>
    %c0_i32_4 = arith.constant 0 : i32
    %8 = vector.broadcast %c0_i32_4 : i32 to vector<4x256xi32>
    %9 = arith.cmpi ne, %7, %8 : vector<4x256xi32>
    %c0_i32_5 = arith.constant 0 : i32
    %10 = vector.broadcast %c0_i32_5 : i32 to vector<4x256xi32>
    %11 = arith.cmpi slt, %7, %10 : vector<4x256xi32>
    %c0_i32_6 = arith.constant 0 : i32
    %12 = arith.cmpi slt, %5, %c0_i32_6 : i32
    %13 = vector.broadcast %12 : i1 to vector<4x256xi1>
    %14 = vector.broadcast %13 : vector<4x256xi1> to vector<4x256xi1>
    %15 = arith.xori %11, %14 : vector<4x256xi1>
    %16 = arith.andi %15, %9 : vector<4x256xi1>
    %17 = vector.broadcast %5 : i32 to vector<4x256xi32>
    %18 = arith.addi %7, %17 : vector<4x256xi32>
    %19 = arith.select %16, %18, %7 : vector<4x256xi1>, vector<4x256xi32>
    %c1_i32_7 = arith.constant 1 : i32
    %20 = vector.broadcast %c1_i32_7 : i32 to vector<4x256xi32>
    %21 = arith.cmpi sge, %19, %20 : vector<4x256xi32>
    %c14_i32 = arith.constant 14 : i32
    %22 = vector.broadcast %c14_i32 : i32 to vector<4x256xi32>
    %23 = arith.cmpi sle, %19, %22 : vector<4x256xi32>
    %24 = vector.extract_strided_slice %2 {offsets = [0, 9], sizes = [4, 1], strides = [1, 1]} : vector<4x12xf32> to vector<4x1xf32>
    %25 = vector.extract_strided_slice %1 {offsets = [0, 0], sizes = [4, 256], strides = [1, 1]} : vector<4x384xf32> to vector<4x256xf32>
    %cst = arith.constant 0.000000e+00 : f32
    %26 = vector.broadcast %cst : f32 to vector<4x256xf32>
    %27 = arith.select %21, %25, %26 : vector<4x256xi1>, vector<4x256xf32>
    %28 = vector.extract_strided_slice %2 {offsets = [0, 0], sizes = [4, 1], strides = [1, 1]} : vector<4x12xf32> to vector<4x1xf32>
    %29 = vector.broadcast %28 : vector<4x1xf32> to vector<4x256xf32>
    %30 = arith.mulf %27, %29 : vector<4x256xf32>
    %31 = vector.broadcast %24 : vector<4x1xf32> to vector<4x256xf32>
    %32 = arith.addf %30, %31 : vector<4x256xf32>
    %33 = vector.extract_strided_slice %1 {offsets = [0, 1], sizes = [4, 256], strides = [1, 1]} : vector<4x384xf32> to vector<4x256xf32>
    %34 = vector.extract_strided_slice %2 {offsets = [0, 1], sizes = [4, 1], strides = [1, 1]} : vector<4x12xf32> to vector<4x1xf32>
    %35 = vector.broadcast %34 : vector<4x1xf32> to vector<4x256xf32>
    %36 = arith.mulf %33, %35 : vector<4x256xf32>
    %37 = arith.addf %32, %36 : vector<4x256xf32>
    %38 = vector.extract_strided_slice %1 {offsets = [0, 2], sizes = [4, 256], strides = [1, 1]} : vector<4x384xf32> to vector<4x256xf32>
    %cst_8 = arith.constant 0.000000e+00 : f32
    %39 = vector.broadcast %cst_8 : f32 to vector<4x256xf32>
    %40 = arith.select %23, %38, %39 : vector<4x256xi1>, vector<4x256xf32>
    %41 = vector.extract_strided_slice %2 {offsets = [0, 2], sizes = [4, 1], strides = [1, 1]} : vector<4x12xf32> to vector<4x1xf32>
    %42 = vector.broadcast %41 : vector<4x1xf32> to vector<4x256xf32>
    %43 = arith.mulf %40, %42 : vector<4x256xf32>
    %44 = arith.addf %37, %43 : vector<4x256xf32>
    %45 = vector.extract_strided_slice %1 {offsets = [0, 16], sizes = [4, 256], strides = [1, 1]} : vector<4x384xf32> to vector<4x256xf32>
    %cst_9 = arith.constant 0.000000e+00 : f32
    %46 = vector.broadcast %cst_9 : f32 to vector<4x256xf32>
    %47 = arith.select %21, %45, %46 : vector<4x256xi1>, vector<4x256xf32>
    %48 = vector.extract_strided_slice %2 {offsets = [0, 3], sizes = [4, 1], strides = [1, 1]} : vector<4x12xf32> to vector<4x1xf32>
    %49 = vector.broadcast %48 : vector<4x1xf32> to vector<4x256xf32>
    %50 = arith.mulf %47, %49 : vector<4x256xf32>
    %51 = arith.addf %44, %50 : vector<4x256xf32>
    %52 = vector.extract_strided_slice %1 {offsets = [0, 17], sizes = [4, 256], strides = [1, 1]} : vector<4x384xf32> to vector<4x256xf32>
    %53 = vector.extract_strided_slice %2 {offsets = [0, 4], sizes = [4, 1], strides = [1, 1]} : vector<4x12xf32> to vector<4x1xf32>
    %54 = vector.broadcast %53 : vector<4x1xf32> to vector<4x256xf32>
    %55 = arith.mulf %52, %54 : vector<4x256xf32>
    %56 = arith.addf %51, %55 : vector<4x256xf32>
    %57 = vector.extract_strided_slice %1 {offsets = [0, 18], sizes = [4, 256], strides = [1, 1]} : vector<4x384xf32> to vector<4x256xf32>
    %cst_10 = arith.constant 0.000000e+00 : f32
    %58 = vector.broadcast %cst_10 : f32 to vector<4x256xf32>
    %59 = arith.select %23, %57, %58 : vector<4x256xi1>, vector<4x256xf32>
    %60 = vector.extract_strided_slice %2 {offsets = [0, 5], sizes = [4, 1], strides = [1, 1]} : vector<4x12xf32> to vector<4x1xf32>
    %61 = vector.broadcast %60 : vector<4x1xf32> to vector<4x256xf32>
    %62 = arith.mulf %59, %61 : vector<4x256xf32>
    %63 = arith.addf %56, %62 : vector<4x256xf32>
    %64 = vector.extract_strided_slice %1 {offsets = [0, 32], sizes = [4, 256], strides = [1, 1]} : vector<4x384xf32> to vector<4x256xf32>
    %cst_11 = arith.constant 0.000000e+00 : f32
    %65 = vector.broadcast %cst_11 : f32 to vector<4x256xf32>
    %66 = arith.select %21, %64, %65 : vector<4x256xi1>, vector<4x256xf32>
    %67 = vector.extract_strided_slice %2 {offsets = [0, 6], sizes = [4, 1], strides = [1, 1]} : vector<4x12xf32> to vector<4x1xf32>
    %68 = vector.broadcast %67 : vector<4x1xf32> to vector<4x256xf32>
    %69 = arith.mulf %66, %68 : vector<4x256xf32>
    %70 = arith.addf %63, %69 : vector<4x256xf32>
    %71 = vector.extract_strided_slice %1 {offsets = [0, 33], sizes = [4, 256], strides = [1, 1]} : vector<4x384xf32> to vector<4x256xf32>
    %72 = vector.extract_strided_slice %2 {offsets = [0, 7], sizes = [4, 1], strides = [1, 1]} : vector<4x12xf32> to vector<4x1xf32>
    %73 = vector.broadcast %72 : vector<4x1xf32> to vector<4x256xf32>
    %74 = arith.mulf %71, %73 : vector<4x256xf32>
    %75 = arith.addf %70, %74 : vector<4x256xf32>
    %76 = vector.extract_strided_slice %1 {offsets = [0, 34], sizes = [4, 256], strides = [1, 1]} : vector<4x384xf32> to vector<4x256xf32>
    %cst_12 = arith.constant 0.000000e+00 : f32
    %77 = vector.broadcast %cst_12 : f32 to vector<4x256xf32>
    %78 = arith.select %23, %76, %77 : vector<4x256xi1>, vector<4x256xf32>
    %79 = vector.extract_strided_slice %2 {offsets = [0, 8], sizes = [4, 1], strides = [1, 1]} : vector<4x12xf32> to vector<4x1xf32>
    %80 = vector.broadcast %79 : vector<4x1xf32> to vector<4x256xf32>
    %81 = arith.mulf %78, %80 : vector<4x256xf32>
    %82 = arith.addf %75, %81 : vector<4x256xf32>
    %cst_13 = arith.constant dense<0.000000e+00> : vector<4xf32>
    %83 = vector.multi_reduction <add>, %82, %cst_13 [1] : vector<4x256xf32> to vector<4xf32>
    %84 = vector.shape_cast %83 : vector<4xf32> to vector<4x1xf32>
    %cst_14 = arith.constant 3.906250e-03 : f32
    %85 = vector.broadcast %cst_14 : f32 to vector<4x1xf32>
    %86 = arith.mulf %84, %85 : vector<4x1xf32>
    %87 = arith.mulf %82, %82 : vector<4x256xf32>
    %cst_15 = arith.constant dense<0.000000e+00> : vector<4xf32>
    %88 = vector.multi_reduction <add>, %87, %cst_15 [1] : vector<4x256xf32> to vector<4xf32>
    %89 = vector.shape_cast %88 : vector<4xf32> to vector<4x1xf32>
    %cst_16 = arith.constant 3.906250e-03 : f32
    %90 = vector.broadcast %cst_16 : f32 to vector<4x1xf32>
    %91 = arith.mulf %89, %90 : vector<4x1xf32>
    %92 = arith.mulf %86, %86 : vector<4x1xf32>
    %93 = arith.subf %91, %92 : vector<4x1xf32>
    %cst_17 = arith.constant 0.000000e+00 : f32
    %94 = vector.broadcast %cst_17 : f32 to vector<4x1xf32>
    %95 = arith.maximumf %93, %94 : vector<4x1xf32>
    %cst_18 = arith.constant 9.99999974E-6 : f32
    %96 = vector.broadcast %cst_18 : f32 to vector<4x1xf32>
    %97 = arith.addf %95, %96 : vector<4x1xf32>
    %98 = math.rsqrt %97 : vector<4x1xf32>
    %99 = vector.broadcast %86 : vector<4x1xf32> to vector<4x256xf32>
    %100 = arith.subf %82, %99 : vector<4x256xf32>
    %101 = vector.broadcast %98 : vector<4x1xf32> to vector<4x256xf32>
    %102 = arith.mulf %100, %101 : vector<4x256xf32>
    %103 = vector.extract_strided_slice %2 {offsets = [0, 10], sizes = [4, 1], strides = [1, 1]} : vector<4x12xf32> to vector<4x1xf32>
    %104 = vector.broadcast %103 : vector<4x1xf32> to vector<4x256xf32>
    %105 = arith.mulf %102, %104 : vector<4x256xf32>
    %106 = vector.extract_strided_slice %2 {offsets = [0, 11], sizes = [4, 1], strides = [1, 1]} : vector<4x12xf32> to vector<4x1xf32>
    %107 = vector.broadcast %106 : vector<4x1xf32> to vector<4x256xf32>
    %108 = arith.addf %105, %107 : vector<4x256xf32>
    %c0_19 = arith.constant 0 : index
    %c0_20 = arith.constant 0 : index
    %109 = vector.load %arg3[%c0_19, %c0_20] : memref<8x5xf32, #tpu.memory_space<vmem>>, vector<8x4xf32>
    %c0_21 = arith.constant 0 : index
    %c4 = arith.constant 4 : index
    %110 = vector.load %arg3[%c0_21, %c4] : memref<8x5xf32, #tpu.memory_space<vmem>>, vector<8x1xf32>
    %cst_22 = arith.constant dense<0.000000e+00> : vector<8x256xf32>
    %111 = tpu.matmul %109, %108, %cst_22 {dimension_numbers = #tpu.dot_dimension_numbers<[1], [0], [0], [1], [0, 0, 1, 1], [], []>} : vector<8x4xf32>, vector<4x256xf32>, vector<8x256xf32> -> vector<8x256xf32>
    %112 = vector.broadcast %110 : vector<8x1xf32> to vector<8x256xf32>
    %113 = arith.addf %111, %112 : vector<8x256xf32>
    %c0_23 = arith.constant 0 : index
    %c0_24 = arith.constant 0 : index
    %c0_25 = arith.constant 0 : index
    %114 = vector.load %arg4[%c0_23, %c0_24, %c0_25] : memref<1x8x256xf32, #tpu.memory_space<vmem>>, vector<1x8x256xf32>
    %115 = vector.shape_cast %114 : vector<1x8x256xf32> to vector<8x256xf32>
    %116 = vector.shape_cast %113 : vector<8x256xf32> to vector<1x8x256xf32>
    tpu.vector_store %arg4[%c0_23, %c0_24, %c0_25], %116 {strides = array<i32>} : memref<1x8x256xf32, #tpu.memory_space<vmem>>, vector<1x8x256xf32>,
    return
  }
  func.func @transform_0(%arg0: i32) -> (i32, i32, i32) {
    %c0_i32 = arith.constant 0 : i32
    %c0_i32_0 = arith.constant 0 : i32
    %c0_i32_1 = arith.constant 0 : i32
    return %arg0, %c0_i32, %c0_i32_0 : i32, i32, i32
  }
  func.func @transform_1(%arg0: i32) -> (i32, i32) {
    %c0_i32 = arith.constant 0 : i32
    %c0_i32_0 = arith.constant 0 : i32
    %c0_i32_1 = arith.constant 0 : i32
    return %c0_i32, %c0_i32_0 : i32, i32
  }
  func.func @transform_2(%arg0: i32) -> (i32, i32) {
    %c0_i32 = arith.constant 0 : i32
    %c0_i32_0 = arith.constant 0 : i32
    %c0_i32_1 = arith.constant 0 : i32
    return %c0_i32, %c0_i32_0 : i32, i32
  }
  func.func @transform_3(%arg0: i32) -> (i32, i32, i32) {
    %c0_i32 = arith.constant 0 : i32
    %c0_i32_0 = arith.constant 0 : i32
    %c0_i32_1 = arith.constant 0 : i32
    return %arg0, %c0_i32, %c0_i32_0 : i32, i32, i32
  }
}

</mosaic_0001>

<bundles_post_ra>
// kernel: tpu_custom_call.1
= control target key start
LH: loop header
LB: loop body
LE: loop exit
PB: predicated region body
PF: predicated region fallthrough
CT: control target
= control target key end

     0   :  { %8 = vsyncpa [#allocation3], 0  ;;  %s1345_s0 = inlined_call_operand.hbm [shape: f32[2,4,384], index: 0, kind: input, shape index: {}]   ;;  %s1346_s1 = inlined_call_operand.hbm [shape: f32[4,12], index: 1, kind: input, shape index: {}]   ;;  %s1347_s2 = inlined_call_operand.hbm [shape: f32[8,5], index: 2, kind: input, shape index: {}]   ;;  %s1348_s3 = inlined_call_operand.hbm [shape: f32[2,8,256], index: 3, kind: output, shape index: {}]  }
   0x1   :  { %10 = vsyncpa [#allocation3 + $0x1], 0 }
   0x2   :  { %11 = vsyncpa [#allocation6], 0 }
   0x3   :  { %12 = vsyncpa [#allocation4], 0 }
   0x4   :  { %14 = vsyncpa [#allocation4 + $0x1], 0  ;;  %s1017_s12 = smov 0   ;;  %s1019_s13 = smov 0  }
   0x5   :  { %s1021_s14 = smov 0   ;;  %s1023_s15 = smov 0  }
   0x6 LB: > { %s1038_s16 = sadd.s32 4294967295, %s969_s15   ;;  %s685_s17 = sadd.s32 4294967294, %s969_s15   ;;  %s969_s15 = sphi %s1023_s15, %s1376_s15   ;;  %s965_s14 = sphi %s1021_s14, %s1375_s14   ;;  %s961_s13 = sphi %s1019_s13, %s1374_s13   ;;  %s957_s12 = sphi %s1017_s12, %s1373_s12  }
   0x7   : > { %p40_p0 = scmp.ne.s32.totalorder %s961_s13, %s957_s12  ;;  %p1349_p1 = scmp.eq.s32.totalorder %s1038_s16, 0 }
   0x8   : > { %p112_p3 = scmp.eq.s32.totalorder %s685_s17, 1  ;;  %p686_p5 = scmp.ge.s32.totalorder %s969_s15, 1 }
   0x9   : > { %p1047_p4 = por %p1349_p1, %p40_p0  ;;  %p119_p7 = scmp.lt.s32.totalorder %s969_s15, 3 }
   0xa   : > { %p1052_p6 = por %p112_p3, %p40_p0  ;;  %s971_s21 = smov [#allocation5]  }
   0xb   : > { %s1352_s18 = scalar_select %p1047_p4, 1, 0 }
   0xc   : > { %s1353_s19 = scalar_select %p1052_p6, 1, 0 }
   0xd   : > { %p1057_p8 = pnand %p686_p5, %p119_p7  ;;  %s132_s22 = sshll.u32 %s971_s21, 4  ;;  %s133_s22 = int_to_ptr.vmem [resolvable:$true] %s132_s22 }
   0xe   : > { %s972_s23 = smov [#allocation7]   ;;  %s1073_s26 = sadd.s32 1, %s969_s15  }
   0xf   : > { %s1354_s20 = scalar_select %p1057_p8, 1, 0 }
  0x10   : > { %p719_p10 = pneg %p1057_p8  ;;  %s143_s24 = sshll.u32 %s972_s23, 4  ;;  %s1070_s24 = int_to_ptr.vmem [resolvable:$true] %s143_s24 }
  0x11   : > { %s24_s27 = ssub.s32 %s969_s15, %s1073_s26  ;;  %s813_s30 = scalar_lea.hbm %s1346_s1, 64 }
  0x12   : > { %p1066_p11 = pnand %p719_p10, %p1349_p1  ;;  %p814_p12 = scmp.ne.s32.totalorder %s1346_s1, %s813_s30 }
  0x13   : > { %p820_p5 = scmp.lt.u32.totalorder %s813_s30, %s1346_s1 }
  0x14   : > { %p815_p13 = pneg %p1066_p11 }
  0x16   : > { %p816_p0 = pnand %p815_p13, %p814_p12 }
  0x18   : > { %p817_p3 = pneg %p816_p0 }
  0x1a   : > { %p822_p7 = pnand %p820_p5, %p817_p3 }
  0x1c   : > { %825 = shalt.err (!%p822_p7)
}
  0x1d   : > { %s826_s8 = scalar_lea.vmem %s133_s22, 64  ;;  %p834_p2 = scmp.lt.s32.totalorder %s133_s22, %s133_s22 }
  0x1e   : > { %p827_p10 = scmp.ne.s32.totalorder %s133_s22, %s826_s8  ;;  %p835_p6 = scmp.lt.s32.totalorder %s826_s8, %s826_s8 }
  0x20   : > { %p829_p9 = pnand %p827_p10, %p815_p13  ;;  %p836_p4 = por %p835_p6, %p834_p2 }
  0x22   : > { %p830_p1 = pneg %p829_p9 }
  0x24   : > { %p837_p8 = pnand %p836_p4, %p830_p1 }
  0x26   : > { %840 = shalt.err (!%p837_p8)
}
  0x27   : > { %722 = dma.hbm_to_vmem [thread:$0]  (!%p1066_p11), %s1346_s1, 64, %s133_s22, [#allocation6]  }
  0x28   : > { %s841_s21 = scalar_lea.hbm %s1347_s2, 128 }
  0x29   : > { %p842_p9 = scmp.ne.s32.totalorder %s1347_s2, %s841_s21  ;;  %p848_p4 = scmp.lt.u32.totalorder %s841_s21, %s1347_s2 }
  0x2b   : > { %p844_p2 = pnand %p842_p9, %p815_p13 }
  0x2d   : > { %p845_p1 = pneg %p844_p2 }
  0x2f   : > { %p850_p6 = pnand %p848_p4, %p845_p1 }
  0x31   : > { %853 = shalt.err (!%p850_p6)
}
  0x32   : > { %s854_s22 = scalar_lea.vmem %s1070_s24, 128  ;;  %p862_p3 = scmp.lt.s32.totalorder %s1070_s24, %s1070_s24 }
  0x33   : > { %p855_p8 = scmp.ne.s32.totalorder %s1070_s24, %s854_s22  ;;  %p863_p5 = scmp.lt.s32.totalorder %s854_s22, %s854_s22 }
  0x35   : > { %p857_p12 = pnand %p855_p8, %p815_p13  ;;  %p864_p7 = por %p863_p5, %p862_p3 }
  0x37   : > { %p858_p0 = pneg %p857_p12 }
  0x39   : > { %p865_p10 = pnand %p864_p7, %p858_p0 }
  0x3b   : > { %868 = shalt.err (!%p865_p10)
}
  0x3c   : > { %725 = dma.hbm_to_vmem [thread:$0]  (!%p1066_p11), %s1347_s2, 128, %s1070_s24, [#allocation6]  }
  0x3d   : > { %p25_p13 = scmp.eq.s32.totalorder %s24_s27, 0  ;;  %s27_s6 = sadd.s32 1, %s965_s14 }
  0x3e   : > { %p34_p9 = scmp.ne.s32.totalorder %s965_s14, %s961_s13  ;;  %p35_p2 = scmp.eq.s32.totalorder %s969_s15, 0 }
  0x3f   : > { %s1132_s25 = scalar_select %p25_p13, %s965_s14, %s27_s6  }
  0x40   : > { %p36_p1 = por %p35_p2, %p34_p9  ;;  %p1356_p4 = scmp.eq.s32.totalorder %s1038_s16, 1 }
  0x41   : > { %p736_p8 = scmp.lt.s32.totalorder %s969_s15, 2  ;;  %s154_s8 = sand.u32 1, %s965_s14  }
  0x42   : > { %p1136_p6 = por %p1356_p4, %p34_p9  ;;  %s704_s9 = smul.u32 12, %s154_s8 }
  0x43   : > { %s705_s10 = smul.u32 192, %s969_s15  ;;  %p1143_p12 = pnand %p736_p8, %p36_p1 }
  0x44   : > { %s158_s21 = scalar_lea.vmem [#allocation2], %s704_s9  ;;  %s155_s28 = scalar_lea.sflag [#allocation3], %s154_s8 }
  0x45   : > { %s1150_s17 = scalar_lea.hbm %s1345_s0, %s705_s10  ;;  %s166_s23 = sshll.u32 %s158_s21, 4  ;;  %s1152_s23 = int_to_ptr.vmem [resolvable:$true] %s166_s23 }
  0x46   : > { %s869_s29 = scalar_lea.hbm %s1150_s17, 192  ;;  %p871_p0 = pneg %p1143_p12 }
  0x47   : > { %p870_p11 = scmp.ne.s32.totalorder %s1150_s17, %s869_s29  ;;  %s874_s4 = scalar_lea.hbm %s1345_s0, 384 }
  0x48   : > { %p875_p7 = scmp.lt.u32.totalorder %s1150_s17, %s1345_s0  ;;  %p876_p10 = scmp.lt.u32.totalorder %s874_s4, %s869_s29 }
  0x49   : > { %p872_p3 = pnand %p871_p0, %p870_p11  ;;  %p878_p9 = scmp.lt.u32.totalorder %s869_s29, %s1150_s17 }
  0x4a   : > { %p877_p13 = por %p876_p10, %p875_p7 }
  0x4b   : > { %p873_p5 = pneg %p872_p3 }
  0x4c   : > { %p879_p2 = por %p878_p9, %p877_p13 }
  0x4e   : > { %p880_p1 = pnand %p879_p2, %p873_p5 }
  0x50   : > { %883 = shalt.err (!%p880_p1)
}
  0x51   : > { %s884_s8 = scalar_lea.vmem %s1152_s23, 192  ;;  %s973_s9 = smov [#allocation2]  }
  0x52   : > { %p885_p4 = scmp.ne.s32.totalorder %s1152_s23, %s884_s8  ;;  %s889_s10 = sshll.u32 %s973_s9, 4  ;;  %s890_s10 = int_to_ptr.vmem [resolvable:$false] %s889_s10 }
  0x53   : > { %s891_s24 = scalar_lea.vmem %s890_s10, 384  ;;  %p892_p3 = scmp.lt.s32.totalorder %s1152_s23, %s890_s10 }
  0x54   : > { %p887_p8 = pnand %p885_p4, %p871_p0  ;;  %p893_p7 = scmp.lt.s32.totalorder %s891_s24, %s884_s8 }
  0x56   : > { %p888_p11 = pneg %p887_p8  ;;  %p894_p10 = por %p893_p7, %p892_p3 }
  0x58   : > { %p895_p13 = pnand %p894_p10, %p888_p11 }
  0x5a   : > { %898 = shalt.err (!%p895_p13)
}
  0x5b   : > { %729 = dma.hbm_to_vmem [thread:$0]  (!%p1143_p12), %s1150_s17, 192, %s1152_s23, %s155_s28  }
  0x5c   : > { %p1359_p5 = scmp.ne.s32.totalorder %s1354_s20, 0 }
  0x5d   : > { %s1182_s27 = sand.u32 (!%p1359_p5), 1, %s961_s13   ;;  %p1360_p0 = scmp.ne.s32.totalorder (!%p1359_p5), %s1352_s18, 0 }
  0x5e   : > { %175 = sbr.rel (%p1359_p5) target bundleno = 787 (0x313), region = 32  ;;  %s178_s29 = scalar_lea.sflag (!%p1359_p5), [#allocation3], %s1182_s27 }
  0x5f   : > { %s706_s21 = smul.u32 (!%p1359_p5), 12, %s1182_s27 }
  0x61   : > { %s1186_s30 = scalar_lea.vmem (!%p1359_p5), [#allocation2], %s706_s21 }
  0x65   : > { %944 = dma.done.wait (%p1360_p0), %s178_s29, 192  }
  0x66   : > { %946 = vsyncadd (%p1360_p0), %s178_s29, 4294967104  ;;  %p1361_p12 = scmp.eq.s32.totalorder %s1038_s16, 0 }
  0x68   : > { %948 = dma.done.wait (%p1361_p12), [#allocation6], 192   ;;  %p1362_p9 = pmov %p1361_p12 }
  0x69   : > { %v974_v0 = vmov 1   ;;  %v975_v1 = vmov 7   ;;  %v1196_v2 = vld [vmem:[#allocation5] sm:$0xf]  ;;  %v976_v3 = vmov 4   ;;  %v977_v4 = vmov 0  }
  0x6a   : > { %950 = vsyncadd (%p1362_p9), [#allocation6], 4294967104  ;;  %796 = vset.pattern.permute.xlu0 %v974_v0  ;;  %798 = vset.pattern.permute.xlu1 %v975_v1  ;;  %v978_v5 = vmov 9   ;;  %v979_v6 = vmov 2   ;;  %v1204_v7 = vld [vmem:[%s1186_s30] sm:$0xff]  ;;  %v980_v9 = vmov 3   ;;  %v215_v14 = vlaneseq }
  0x6b   : > { %265 = vperm.xlu0 %796, %v1196_v2   ;;  %408 = vperm.xlu1 %798, %v1196_v2   ;;  %v1210_v8 = vcombine.high %v1204_v7, %v1204_v7  ;;  %s981_s18 = smov 126   ;;  %v982_v10 = vmov 8   ;;  %s983_s20 = smov 112   ;;  %v213_v11 = vld [vmem:[%s1186_s30 + $0x8] sm:$0xf]  ;;  %v984_v12 = vmov 5  }
  0x6c   : > { %s985_s11 = smov 110   ;;  %v986_v13 = vmov 6   ;;  %s987_s17 = smov 96   ;;  %v988_v15 = vmov 839922192   ;;  %v271_v18 = vshrl.u32 %v215_v14, 7 }
  0x6d   : > { %v268_v16 = vunpack.c.l.s4 %v988_v15  ;;  %s989_s23 = smov 127   ;;  %s990_s28 = smov 111   ;;  %v993_v35 = vmov 10   ;;  %v994_v36 = vmov 11   ;;  %v216_v52 = vand.u32 127, %v215_v14 }
  0x6e   : > { %s991_s22 = smov 94   ;;  %s992_s4 = smov 95   ;;  %vm300_vm2 = vcmask 1031168   ;;  %vm321_vm3 = vcmask 916480   ;;  %vm371_vm6 = vcmask 900096   ;;  %vm286_vm7 = vcmask 1039360  }
  0x6f   : > { %797 = vset.pattern.permute.xlu0 %v976_v3  ;;  %799 = vset.pattern.permute.xlu1 %v977_v4  ;;  %v269_v17 = vunpack.c.0.s8 %v268_v16  ;;  %v217_v54 = vadd.s32 128, %v216_v52  ;;  %v222_v57 = vand.u32 15, %v216_v52  ;;  %vm392_vm8 = vcmask 785408   ;;  %s694_s5 = sshll.u32 %s1182_s27, 4  ;;  %s703_s6 = sshll.u32 %s1038_s16, 8 }
  0x70   : > { %337 = vperm.xlu0 %797, %v1196_v2   ;;  %253 = vperm.xlu1 %799, %v1196_v2   ;;  %vm358_vm9 = vcmask 908288   ;;  %vm442_vm10 = vcmask 769024   ;;  %vm429_vm11 = vcmask 777216   ;;  %vm457_vm12 = vcmask 1043456   ;;  %s211_s8 = scalar_lea.vmem [#allocation8], %s694_s5  ;;  %s1301_s21 = scalar_lea.hbm %s1348_s3, %s703_s6 }
  0x71   : > { %v272_v19 = vsub.s32 %v269_v17, %v271_v18  ;;  %v229_v58 = vand.u32 15, %v217_v54  ;;  %vm1236_vm0 = vcmp.ge.s32.totalorder %v222_v57, 1  ;;  %vm1250_vm4 = vcmp.le.s32.totalorder %v222_v57, 14  ;;  %s596_s9 = sshll.u32 %s211_s8, 4  ;;  %s582_s29 = scalar_lea.sflag [#allocation4], %s1182_s27  ;;  %s1303_s9 = int_to_ptr.vmem [resolvable:$true] %s596_s9 }
  0x72   : > { %v249_v0 = vsel %vm1236_vm0, %v1204_v7, 0.0  ;;  %vm499_vm13 = vcmask 31744   ;;  %s899_s16 = scalar_lea.vmem %s1303_s9, 256  ;;  %s996_s30 = smov [#allocation8]  }
  0x73   : > { %vm1240_vm1 = vcmp.ge.s32.totalorder %v229_v58, 1  ;;  %vm1254_vm5 = vcmp.le.s32.totalorder %v229_v58, 14  ;;  %p900_p2 = scmp.ne.s32.totalorder %s1303_s9, %s899_s16 }
  0x74   : > { %800 = vset.pattern.permute.xlu1 %v978_v5  ;;  %801 = vset.pattern.permute.xlu0 %v979_v6  ;;  %v250_v4 = vsel %vm1240_vm1, %v1210_v8, 0.0 }
  0x75   : > { %259 = vperm.xlu1 %800, %v1196_v2   ;;  %308 = vperm.xlu0 %801, %v1196_v2   ;;  %p901_p1 = pnand %p900_p2, %p1136_p6 }
  0x77   : > { %p902_p4 = pneg %p901_p1 }
  0x79   : > { %802 = vset.pattern.permute.xlu1 %v980_v9  ;;  %296 = vrot.lane.b32.xlu0 %v1210_v8, %s981_s18 }
  0x7a   : > { %329 = vperm.xlu1 %802, %v1196_v2   ;;  %805 = vset.pattern.permute.xlu0 %v982_v10 }
  0x7d   : > { %315 = vrot.lane.b32.xlu0 %v1204_v7, %s983_s20 }
  0x7e   : > { %294 = vrot.lane.b32.xlu1 %v1204_v7, %s981_s18 }
  0x7f   : > { %803 = vset.pattern.permute.xlu1 %v984_v12 }
  0x81   : > { %319 = vrot.lane.b32.xlu0 %v213_v11, %s983_s20 }
  0x82   : > { %298 = vrot.lane.b32.xlu1 %v213_v11, %s981_s18  ;;  %s903_s18 = sshll.u32 %s996_s30, 4  ;;  %s904_s18 = int_to_ptr.vmem [resolvable:$false] %s903_s18 }
  0x83   : > { %p906_p8 = scmp.lt.s32.totalorder %s1303_s9, %s904_s18 }
  0x85   : > { %365 = vrot.lane.b32.xlu0 %v1204_v7, %s985_s11 }
  0x86   : > { %379 = vperm.xlu1 %803, %v1196_v2  }
  0x89   : > { %369 = vrot.lane.b32.xlu0 %v213_v11, %s985_s11 }
  0x8a   : > { %317 = vrot.lane.b32.xlu1 %v1210_v8, %s983_s20  ;;  %s905_s20 = scalar_lea.vmem %s904_s18, 512 }
  0x8b   : > { %804 = vset.pattern.permute.xlu1 %v986_v13  ;;  %p907_p11 = scmp.lt.s32.totalorder %s905_s20, %s899_s16 }
  0x8d   : > { %450 = vperm.xlu0 %805, %v1196_v2   ;;  %p908_p3 = por %p907_p11, %p906_p8 }
  0x8e   : > { %400 = vperm.xlu1 %804, %v1196_v2  }
  0x8f   : > { %p909_p7 = pnand %p908_p3, %p902_p4 }
  0x91   : > { %390 = vrot.lane.b32.xlu0 %v213_v11, %s987_s17 }
  0x92   : > { %367 = vrot.lane.b32.xlu1 %v1210_v8, %s985_s11  ;;  %806 = vset.pattern.permute.xlu0 %v993_v35 }
  0x93   : > { %807 = vset.pattern.permute.xlu1 %v994_v36 }
  0x96   : > { %386 = vrot.lane.b32.xlu1 %v1204_v7, %s987_s17 }
  0x9a   : > { %388 = vrot.lane.b32.xlu1 %v1210_v8, %s987_s17 }
  0xea   : > { %v266_v20 = vpop.permute.xlu0 %265  ;;  %v409_v27 = vpop.permute.xlu1 %408 }
  0xeb   : > { %v273_v21 = vrot.slane %v266_v20, %v272_v19  ;;  %v416_v29 = vrot.slane %v409_v27, %v272_v19 }
  0xed   : > { %v275_v22 = vmul.f32 %v273_v21, %v1204_v7  ;;  %v276_v25 = vmul.f32 %v273_v21, %v213_v11  ;;  %v418_v32 = vmul.f32 %v416_v29, %v1204_v7  ;;  %v419_v33 = vmul.f32 %v416_v29, %v213_v11 }
  0xef   : > { %v338_v23 = vpop.permute.xlu0 %337  ;;  %280 = vrot.lane.b32.xlu0 %v275_v22, %s989_s23  ;;  %v279_v31 = vcombine.high %v275_v22, %v275_v22  ;;  %v422_v34 = vcombine.high %v418_v32, %v418_v32  ;;  %v254_v37 = vpop.permute.xlu1 %253 }
  0xf0   : > { %v345_v24 = vrot.slane %v338_v23, %v272_v19  ;;  %v256_v5 = vmul.f32 %v254_v37, %v249_v0 }
  0xf2   : > { %v347_v26 = vmul.f32 %v345_v24, %v1204_v7  ;;  %v348_v28 = vmul.f32 %v345_v24, %v213_v11 }
  0xf3   : > { %284 = vrot.lane.b32.xlu0 %v276_v25, %s989_s23 }
  0xf4   : > { %352 = vrot.lane.b32.xlu1 %v347_v26, %s990_s28  ;;  %v351_v30 = vcombine.high %v347_v26, %v347_v26  ;;  %v260_v38 = vpop.permute.xlu1 %259  ;;  %v309_v40 = vpop.permute.xlu0 %308 }
  0xf5   : > { %v262_v16 = vadd.f32 %v260_v38, %v256_v5 }
  0xf7   : > { %438 = vrot.lane.b32.xlu0 %v1210_v8, %s991_s22 }
  0xf8   : > { %356 = vrot.lane.b32.xlu1 %v348_v28, %s990_s28  ;;  %v297_v42 = vpop.permute.xlu0 %296 }
  0xf9   : > { %v330_v39 = vpop.permute.xlu1 %329 }
  0xfb   : > { %354 = vrot.lane.b32.xlu0 %v351_v30, %s990_s28 }
  0xfc   : > { %282 = vrot.lane.b32.xlu1 %v279_v31, %s989_s23  ;;  %v316_v44 = vpop.permute.xlu0 %315 }
  0xfd   : > { %v295_v41 = vpop.permute.xlu1 %294 }
  0xfe   : > { %v301_v9 = vsel %vm300_vm2, %v295_v41, %v297_v42 }
  0xff   : > { %423 = vrot.lane.b32.xlu0 %v418_v32, %s992_s4  ;;  %v305_v8 = vsel %vm1250_vm4, %v301_v9, 0.0 }
 0x100   : > { %436 = vrot.lane.b32.xlu1 %v1204_v7, %s991_s22  ;;  %v320_v46 = vpop.permute.xlu0 %319  ;;  %v311_v24 = vmul.f32 %v309_v40, %v305_v8 }
 0x101   : > { %v299_v43 = vpop.permute.xlu1 %298 }
 0x102   : > { %v302_v7 = vsel %vm300_vm2, %v297_v42, %v299_v43 }
 0x103   : > { %427 = vrot.lane.b32.xlu0 %v419_v33, %s992_s4  ;;  %v306_v17 = vsel %vm1254_vm5, %v302_v7, 0.0 }
 0x104   : > { %440 = vrot.lane.b32.xlu1 %v213_v11, %s991_s22  ;;  %v366_v47 = vpop.permute.xlu0 %365  ;;  %v257_v11 = vmul.f32 %v254_v37, %v250_v4  ;;  %v312_v27 = vmul.f32 %v309_v40, %v306_v17 }
 0x105   : > { %v1230_v45 = vpop.permute.xlu1 %379 }
 0x106   : > { %v263_v18 = vadd.f32 %v260_v38, %v257_v11 }
 0x108   : > { %425 = vrot.lane.b32.xlu1 %v422_v34, %s992_s4  ;;  %v370_v49 = vpop.permute.xlu0 %369 }
 0x109   : > { %v318_v48 = vpop.permute.xlu1 %317 }
 0x10a   : > { %v322_v14 = vsel %vm321_vm3, %v316_v44, %v318_v48  ;;  %v323_v15 = vsel %vm321_vm3, %v318_v48, %v320_v46 }
 0x10b   : > { %v326_v19 = vsel %vm1236_vm0, %v322_v14, 0.0  ;;  %v327_v20 = vsel %vm1240_vm1, %v323_v15, 0.0 }
 0x10c   : > { %v1234_v51 = vpop.permute.xlu0 %450  ;;  %v332_v31 = vmul.f32 %v330_v39, %v326_v19  ;;  %v333_v32 = vmul.f32 %v330_v39, %v327_v20  ;;  %v493_v19 = vld [vmem:[#allocation7] sm:$0xff] }
 0x10d   : > { %v1232_v50 = vpop.permute.xlu1 %400 }
 0x110   : > { %v391_v56 = vpop.permute.xlu0 %390 }
 0x111   : > { %v368_v53 = vpop.permute.xlu1 %367 }
 0x112   : > { %v372_v21 = vsel %vm371_vm6, %v366_v47, %v368_v53  ;;  %v373_v28 = vsel %vm371_vm6, %v368_v53, %v370_v49 }
 0x113   : > { %v376_v33 = vsel %vm1250_vm4, %v372_v21, 0.0  ;;  %v377_v41 = vsel %vm1254_vm5, %v373_v28, 0.0 }
 0x114   : > { %v382_v40 = vmul.f32 %v1230_v45, %v376_v33  ;;  %v383_v49 = vmul.f32 %v1230_v45, %v377_v41 }
 0x115   : > { %v387_v55 = vpop.permute.xlu1 %386 }
 0x119   : > { %v389_v60 = vpop.permute.xlu1 %388 }
 0x11a   : > { %v393_v34 = vsel %vm392_vm8, %v387_v55, %v389_v60  ;;  %v394_v35 = vsel %vm392_vm8, %v389_v60, %v391_v56 }
 0x11b   : > { %v397_v39 = vsel %vm1236_vm0, %v393_v34, 0.0  ;;  %v398_v46 = vsel %vm1240_vm1, %v394_v35, 0.0 }
 0x11c   : > { %v403_v57 = vmul.f32 %v1232_v50, %v397_v39  ;;  %v404_v58 = vmul.f32 %v1232_v50, %v398_v46 }
 0x161   : > { %v281_v59 = vpop.permute.xlu0 %280 }
 0x165   : > { %v285_v63 = vpop.permute.xlu0 %284 }
 0x166   : > { %v353_v1 = vpop.permute.xlu1 %352 }
 0x169   : > { %v439_v10 = vpop.permute.xlu0 %438 }
 0x16a   : > { %v357_v13 = vpop.permute.xlu1 %356 }
 0x16d   : > { %v355_v22 = vpop.permute.xlu0 %354 }
 0x16e   : > { %v283_v23 = vpop.permute.xlu1 %282  ;;  %v359_v47 = vsel %vm358_vm9, %v353_v1, %v355_v22  ;;  %v360_v48 = vsel %vm358_vm9, %v355_v22, %v357_v13 }
 0x16f   : > { %v287_v25 = vsel %vm286_vm7, %v281_v59, %v283_v23  ;;  %v288_v26 = vsel %vm286_vm7, %v283_v23, %v285_v63 }
 0x170   : > { %v291_v29 = vadd.f32 %v287_v25, %v262_v16  ;;  %v292_v30 = vadd.f32 %v288_v26, %v263_v18 }
 0x171   : > { %v424_v44 = vpop.permute.xlu0 %423 }
 0x172   : > { %v313_v36 = vadd.f32 %v311_v24, %v291_v29  ;;  %v314_v37 = vadd.f32 %v312_v27, %v292_v30  ;;  %v437_v38 = vpop.permute.xlu1 %436 }
 0x173   : > { %v443_v52 = vsel %vm442_vm10, %v437_v38, %v439_v10 }
 0x174   : > { %v334_v42 = vadd.f32 %v332_v31, %v313_v36  ;;  %v335_v43 = vadd.f32 %v333_v32, %v314_v37  ;;  %v447_v61 = vsel %vm1250_vm4, %v443_v52, 0.0 }
 0x175   : > { %v428_v63 = vpop.permute.xlu0 %427  ;;  %v453_v9 = vmul.f32 %v1234_v51, %v447_v61 }
 0x176   : > { %v441_v53 = vpop.permute.xlu1 %440  ;;  %v363_v54 = vadd.f32 %v359_v47, %v334_v42  ;;  %v364_v55 = vadd.f32 %v360_v48, %v335_v43 }
 0x177   : > { %v444_v56 = vsel %vm442_vm10, %v439_v10, %v441_v53 }
 0x178   : > { %v384_v59 = vadd.f32 %v382_v40, %v363_v54  ;;  %v385_v60 = vadd.f32 %v383_v49, %v364_v55  ;;  %v448_v62 = vsel %vm1254_vm5, %v444_v56, 0.0 }
 0x179   : > { %v454_v10 = vmul.f32 %v1234_v51, %v448_v62  ;;  %v995_v51 = vmov 0.0  }
 0x17a   : > { %v426_v45 = vpop.permute.xlu1 %425  ;;  %v405_v0 = vadd.f32 %v403_v57, %v384_v59  ;;  %v406_v1 = vadd.f32 %v404_v58, %v385_v60  ;;  %572 = vmatprep.mubr.f32.mxu0 %v995_v51 }
 0x17b   : > { %v430_v4 = vsel %vm429_vm11, %v424_v44, %v426_v45  ;;  %v431_v5 = vsel %vm429_vm11, %v426_v45, %v428_v63 }
 0x17c   : > { %v434_v11 = vadd.f32 %v430_v4, %v405_v0  ;;  %v435_v50 = vadd.f32 %v431_v5, %v406_v1 }
 0x17e   : > { %v455_v7 = vadd.f32 %v453_v9, %v434_v11  ;;  %v456_v13 = vadd.f32 %v454_v10, %v435_v50 }
 0x180   : > { %v458_v6 = vsel %vm457_vm12, %v455_v7, 0.0  ;;  %v459_v12 = vsel %vm457_vm12, %v456_v13, 0.0  ;;  %v464_v14 = vmul.f32 %v455_v7, %v455_v7  ;;  %v465_v15 = vmul.f32 %v456_v13, %v456_v13 }
 0x181   : > { %v460_v8 = vadd.f32 %v459_v12, %v458_v6 }
 0x182   : > { %v466_v16 = vsel %vm457_vm12, %v464_v14, 0.0  ;;  %v467_v17 = vsel %vm457_vm12, %v465_v15, 0.0 }
 0x183   : > { %461 = vadd.xlane.f32.xlu1 %v460_v8  ;;  %v468_v18 = vadd.f32 %v467_v17, %v466_v16 }
 0x185   : > { %469 = vadd.xlane.f32.xlu0 %v468_v18 }
 0x194   : > { %488 = vperm.xlu1 %807, %v1196_v2  }
 0x198   : > { %808 = vset.pattern.permute.xlu1 %v976_v3 }
 0x199   : > { %496 = vperm.xlu1 %808, %v493_v19  }
 0x19b   : > { %482 = vperm.xlu0 %806, %v1196_v2  }
 0x19f   : > { %809 = vset.pattern.permute.xlu0 %v976_v3 }
 0x210   : > { %v462_v20 = vpop.xlane.xlu1 %461 }
 0x211   : > { %v463_v21 = vmul.f32 0.00390625, %v462_v20 }
 0x212   : > { %v470_v22 = vpop.xlane.xlu0 %469 }
 0x213   : > { %v471_v23 = vmul.f32 0.00390625, %v470_v22  ;;  %v472_v24 = vmul.f32 %v463_v21, %v463_v21  ;;  %v477_v28 = vsub.f32 %v455_v7, %v463_v21  ;;  %v478_v29 = vsub.f32 %v456_v13, %v463_v21 }
 0x214   : > { %v489_v32 = vpop.permute.xlu1 %488 }
 0x215   : > { %v473_v25 = vsub.f32 %v471_v23, %v472_v24 }
 0x217   : > { %v474_v26 = vmax.f32 %v473_v25, 0.0 }
 0x218   : > { %v497_v37 = vpop.permute.xlu1 %496 }
 0x219   : > { %v475_v27 = vadd.f32 1e-05, %v474_v26 }
 0x21a   : > { %v483_v30 = vpop.permute.xlu0 %482 }
 0x21b   : > { %811 = vrsqrt.f32 %v475_v27 }
 0x225   : > { %v812_v2 = vpop.eup %811 }
 0x226   : > { %v479_v3 = vmul.f32 %v812_v2, %v477_v28  ;;  %v480_v31 = vmul.f32 %v812_v2, %v478_v29 }
 0x228   : > { %v485_v33 = vmul.f32 %v483_v30, %v479_v3  ;;  %v486_v34 = vmul.f32 %v483_v30, %v480_v31 }
 0x22a   : > { %v491_v35 = vadd.f32 %v489_v32, %v485_v33  ;;  %v492_v36 = vadd.f32 %v489_v32, %v486_v34 }
 0x22c   : > { %695 = vmatprep.subr.msk.mxu0 %vm457_vm12, %v492_v36 }
 0x22d   : > { %696 = vmatpush1.msk.msra.mxu0 %vm457_vm12, %v491_v35 }
 0x22e   : > { %697 = vmatmul.mubr.msk.f32.vlgmr.msra.gmra.mrb[0].mxu0 %vm499_vm13, %v493_v19 }
 0x301   : > { %v574_v38 = vpop.f32.mrb[0].mxu0 }
 0x302   : > { %v575_v41 = vadd.f32 %v574_v38, %v497_v37  ;;  %v576_v40 = vpop.f32.mrb[1].mxu0 }
 0x303   : > { %v577_v42 = vadd.f32 %v576_v40, %v497_v37 }
 0x304   : > { %579 = vst [vmem:[%s211_s8] sm:$0xff] %v575_v41 }
 0x305   : > { %580 = vst [vmem:[%s211_s8 + $0x8] sm:$0xff] %v577_v42 }
 0x306   : > { %912 = shalt.err (!%p909_p7)
}
 0x307   : > { %s913_s27 = scalar_lea.hbm %s1301_s21, 256  ;;  %s917_s23 = scalar_lea.hbm %s1348_s3, 512 }
 0x308   : > { %p914_p10 = scmp.ne.s32.totalorder %s1301_s21, %s913_s27  ;;  %p918_p0 = scmp.lt.u32.totalorder %s1301_s21, %s1348_s3 }
 0x309   : > { %p919_p12 = scmp.lt.u32.totalorder %s917_s23, %s913_s27  ;;  %p921_p2 = scmp.lt.u32.totalorder %s913_s27, %s1301_s21 }
 0x30a   : > { %p915_p13 = pnand %p914_p10, %p1136_p6 }
 0x30b   : > { %p920_p9 = por %p919_p12, %p918_p0 }
 0x30c   : > { %p916_p5 = pneg %p915_p13 }
 0x30d   : > { %p922_p1 = por %p921_p2, %p920_p9 }
 0x30f   : > { %p923_p4 = pnand %p922_p1, %p916_p5 }
 0x311   : > { %926 = shalt.err (!%p923_p4)
}
 0x312   : > { %717 = dma.vmem_to_hbm [thread:$0]  (%p1136_p6), %s1303_s9, 256, %s1301_s21, %s582_s29  }
 0x313 PF: > { %s608_s4 = sand.u32 1, %s957_s12   ;;  %p1371_p8 = scmp.ne.s32.totalorder %s1353_s19, 0 }
 0x314   : > { %p1372_p11 = scmp.ge.s32.totalorder %s969_s15, 2  ;;  %s609_s5 = scalar_lea.sflag [#allocation4], %s608_s4 }
 0x316   : > { %p731_p3 = pnand %p1372_p11, %p1371_p8 }
 0x318   : > { %952 = dma.done.wait (!%p731_p3), %s609_s5, 256  }
 0x319   : > { %954 = vsyncadd (!%p731_p3), %s609_s5, 4294967040  ;;  %p17_p7 = scmp.ge.s32.totalorder %s1073_s26, 4   ;;  %s1373_s12 = smov %s961_s13 }
 0x31a   : > { %s1374_s13 = smov %s965_s14  ;;  %s1375_s14 = smov %s1132_s25 }
 0x31b   : > { %s1376_s15 = smov %s1073_s26  ;;  %19 = sbr.rel (!%p17_p7) target bundleno = 6 (0x6), region = 85 }
 0x322   :  { %614 = vsyncpa [#allocation3], 1 }
 0x323   :  { %616 = vsyncpa [#allocation3 + $0x1], 1 }
 0x324   :  { %617 = vsyncpa [#allocation6], 1 }
 0x325   :  { %618 = vsyncpa [#allocation4], 1 }
 0x326   :  { %620 = vsyncpa [#allocation4 + $0x1], 1 }

</bundles_post_ra>
